<compile_context>
chip_gen: v6e
topology: v6e:2x2x1
jax: 0.10.0
libtpu: 0.0.40
codegen_flags: <defaults>
</compile_context>

<pallas_src>
import jax
import jax.numpy as jnp
from jax.experimental import pallas as pl
from jax.experimental.pallas import tpu as pltpu

# small shapes consistent with the module (transformer FFN)
B = 2        # batch
S = 8        # sequence length
D_MODEL = 32
D_FF = 128

LANE = 128     # last-dim blocks should be multiples of this (lane-dense)
SUBLANE = 8    # second-minor blocks must be multiples of this
MAX_TM = 1024  # row-tile cap (amortizes per-grid-step overhead)


def _round_up(a, b):
    return (a + b - 1) // b * b


def ffn_kernel(x_ref, w1_ref, b1_ref, w2_ref, b2_ref, o_ref):
    # x_ref: (tm, d_pad) bf16 token tile (lane-dense: d_pad multiple of 128)
    x = x_ref[...]

    # w_1: Linear(d_model, d_ff) -> ReLU.
    # bf16 MXU matmul, f32 accumulation; bias + ReLU in f32.
    h = jnp.dot(x, w1_ref[...], preferred_element_type=jnp.float32) + b1_ref[...]
    h = jnp.maximum(h, 0.0)

    # nn.Dropout is the identity here (inference semantics).
    # TODO(synk): training-mode dropout would use pltpu.prng_seed +
    # pltpu.prng_random_bits + jnp.where on `h` inside this kernel.

    # w_2: Linear(d_ff, d_model).  Cast activations back to bf16 for the MXU.
    y = jnp.dot(h.astype(w2_ref.dtype), w2_ref[...],
                preferred_element_type=jnp.float32) + b2_ref[...]

    # Full-block, lane-dense store (unmasked vst); per-tile output block so the
    # row grid axis is safely "parallel".
    o_ref[...] = y.astype(o_ref.dtype)


@jax.jit
def positionwise_ffn(x, w1, b1, w2, b2):
    """x: (B, S, d_model).  Weights stored as (in, out) = transposed nn.Linear."""
    b, s, d = x.shape
    d_ff = w1.shape[1]
    out_dtype = x.dtype

    n = b * s
    # Lane-dense padding: pad d_model (and d_ff, if needed) up to multiples of
    # 128 so both contractions use full lanes and the output store is unmasked.
    d_pad = _round_up(d, LANE)
    d_ff_pad = _round_up(d_ff, LANE)

    # Row tiling: biggest tile up to MAX_TM; pad the token count so it tiles
    # evenly (padded rows are computed and discarded — cheap vs. grid overhead).
    n_pad = _round_up(n, SUBLANE)
    tm = min(MAX_TM, n_pad)
    n_pad = _round_up(n_pad, tm)
    grid = (n_pad // tm,)

    # bf16 inputs for the MXU; biases stay f32 (added post-matmul in f32).
    x2 = jnp.pad(x.reshape(n, d),
                 ((0, n_pad - n), (0, d_pad - d))).astype(jnp.bfloat16)
    w1p = jnp.pad(w1, ((0, d_pad - d), (0, d_ff_pad - d_ff))).astype(jnp.bfloat16)
    b1p = jnp.pad(b1, ((0, 0), (0, d_ff_pad - d_ff))).astype(jnp.float32)
    w2p = jnp.pad(w2, ((0, d_ff_pad - d_ff), (0, d_pad - d))).astype(jnp.bfloat16)
    b2p = jnp.pad(b2, ((0, 0), (0, d_pad - d))).astype(jnp.float32)

    out = pl.pallas_call(
        ffn_kernel,
        out_shape=jax.ShapeDtypeStruct((n_pad, d_pad), out_dtype),
        grid=grid,
        in_specs=[
            pl.BlockSpec((tm, d_pad), lambda i: (i, 0)),        # token row tile
            pl.BlockSpec((d_pad, d_ff_pad), lambda i: (0, 0)),  # W1 (resident)
            pl.BlockSpec((1, d_ff_pad), lambda i: (0, 0)),      # b1 (resident)
            pl.BlockSpec((d_ff_pad, d_pad), lambda i: (0, 0)),  # W2 (resident)
            pl.BlockSpec((1, d_pad), lambda i: (0, 0)),         # b2 (resident)
        ],
        out_specs=pl.BlockSpec((tm, d_pad), lambda i: (i, 0)),
        compiler_params=pltpu.CompilerParams(
            dimension_semantics=("parallel",)),  # shards rows across v7x TCs when grid > 1
    )(x2, w1p, b1p, w2p, b2p)

    return out[:n, :d].reshape(b, s, d)


def _reference(x, w1, b1, w2, b2):
    # Emulate the kernel numerics: bf16-rounded inputs/weights, f32 accumulation,
    # f32 bias + ReLU, bf16-rounded activations into the second matmul.
    f32 = jnp.float32
    xb = x.astype(jnp.bfloat16).astype(f32)
    w1b = w1.astype(jnp.bfloat16).astype(f32)
    w2b = w2.astype(jnp.bfloat16).astype(f32)
    h = jnp.maximum(jnp.einsum('bsd,df->bsf', xb, w1b,
                               preferred_element_type=f32) + b1, 0.0)
    hb = h.astype(jnp.bfloat16).astype(f32)
    return jnp.einsum('bsf,fd->bsd', hb, w2b, preferred_element_type=f32) + b2


if __name__ == "__main__":
    key = jax.random.PRNGKey(0)
    kx, k1, k2, k3, k4 = jax.random.split(key, 5)

    x = jax.random.normal(kx, (B, S, D_MODEL), jnp.float32)
    scale = 0.05
    w1 = scale * jax.random.normal(k1, (D_MODEL, D_FF), jnp.float32)
    b1 = scale * jax.random.normal(k2, (1, D_FF), jnp.float32)
    w2 = scale * jax.random.normal(k3, (D_FF, D_MODEL), jnp.float32)
    b2 = scale * jax.random.normal(k4, (1, D_MODEL), jnp.float32)

    out = positionwise_ffn(x, w1, b1, w2, b2)
    out = jax.block_until_ready(out)

    ref = _reference(x, w1, b1, w2, b2)
    assert out.shape == (B, S, D_MODEL)
    assert jnp.allclose(out, ref, atol=1e-3, rtol=1e-3), (
        float(jnp.max(jnp.abs(out - ref))))

    print("KERNEL_OK")
</pallas_src>

<mosaic_0001>
module attributes {stable_mosaic.version = 11 : i64} {
  func.func @ffn_kernel(%arg0: i32, %arg1: memref<16x128xbf16, #tpu.memory_space<vmem>>, %arg2: memref<128x128xbf16, #tpu.memory_space<vmem>>, %arg3: memref<1x128xf32, #tpu.memory_space<vmem>>, %arg4: memref<128x128xbf16, #tpu.memory_space<vmem>>, %arg5: memref<1x128xf32, #tpu.memory_space<vmem>>, %arg6: memref<16x128xf32, #tpu.memory_space<vmem>>) attributes {dimension_semantics = [#tpu.dimension_semantics<parallel>], iteration_bounds = array<i64: 1>, scalar_prefetch = 0 : i64, scratch_operands = 0 : i64, tpu.core_type = #tpu.core_type<tc>, window_params = [{transform_indices = @transform_0, window_bounds = array<i64: 16, 128>}, {pipeline_mode = #tpu.pipeline_mode<synchronous>, transform_indices = @transform_1, window_bounds = array<i64: 128, 128>}, {pipeline_mode = #tpu.pipeline_mode<synchronous>, transform_indices = @transform_2, window_bounds = array<i64: 1, 128>}, {pipeline_mode = #tpu.pipeline_mode<synchronous>, transform_indices = @transform_3, window_bounds = array<i64: 128, 128>}, {pipeline_mode = #tpu.pipeline_mode<synchronous>, transform_indices = @transform_4, window_bounds = array<i64: 1, 128>}, {transform_indices = @transform_5, window_bounds = array<i64: 16, 128>}]} {
    %c0 = arith.constant 0 : index
    %c0_0 = arith.constant 0 : index
    %0 = vector.load %arg1[%c0, %c0_0] : memref<16x128xbf16, #tpu.memory_space<vmem>>, vector<16x128xbf16>
    %c0_1 = arith.constant 0 : index
    %c0_2 = arith.constant 0 : index
    %1 = vector.load %arg2[%c0_1, %c0_2] : memref<128x128xbf16, #tpu.memory_space<vmem>>, vector<128x128xbf16>
    %cst = arith.constant dense<0.000000e+00> : vector<16x128xf32>
    %2 = tpu.matmul %0, %1, %cst {dimension_numbers = #tpu.dot_dimension_numbers<[1], [0], [0], [1], [0, 0, 1, 1], [], []>} : vector<16x128xbf16>, vector<128x128xbf16>, vector<16x128xf32> -> vector<16x128xf32>
    %c0_3 = arith.constant 0 : index
    %c0_4 = arith.constant 0 : index
    %3 = vector.load %arg3[%c0_3, %c0_4] : memref<1x128xf32, #tpu.memory_space<vmem>>, vector<1x128xf32>
    %4 = vector.broadcast %3 : vector<1x128xf32> to vector<16x128xf32>
    %5 = arith.addf %2, %4 : vector<16x128xf32>
    %cst_5 = arith.constant 0.000000e+00 : f32
    %6 = vector.broadcast %cst_5 : f32 to vector<16x128xf32>
    %7 = arith.maximumf %5, %6 : vector<16x128xf32>
    %8 = arith.truncf %7 : vector<16x128xf32> to vector<16x128xbf16>
    %c0_6 = arith.constant 0 : index
    %c0_7 = arith.constant 0 : index
    %9 = vector.load %arg4[%c0_6, %c0_7] : memref<128x128xbf16, #tpu.memory_space<vmem>>, vector<128x128xbf16>
    %cst_8 = arith.constant dense<0.000000e+00> : vector<16x128xf32>
    %10 = tpu.matmul %8, %9, %cst_8 {dimension_numbers = #tpu.dot_dimension_numbers<[1], [0], [0], [1], [0, 0, 1, 1], [], []>} : vector<16x128xbf16>, vector<128x128xbf16>, vector<16x128xf32> -> vector<16x128xf32>
    %c0_9 = arith.constant 0 : index
    %c0_10 = arith.constant 0 : index
    %11 = vector.load %arg5[%c0_9, %c0_10] : memref<1x128xf32, #tpu.memory_space<vmem>>, vector<1x128xf32>
    %12 = vector.broadcast %11 : vector<1x128xf32> to vector<16x128xf32>
    %13 = arith.addf %10, %12 : vector<16x128xf32>
    %c0_11 = arith.constant 0 : index
    %c0_12 = arith.constant 0 : index
    %14 = vector.load %arg6[%c0_11, %c0_12] : memref<16x128xf32, #tpu.memory_space<vmem>>, vector<16x128xf32>
    tpu.vector_store %arg6[%c0_11, %c0_12], %13 {strides = array<i32>} : memref<16x128xf32, #tpu.memory_space<vmem>>, vector<16x128xf32>,
    return
  }
  func.func @transform_0(%arg0: i32) -> (i32, i32) {
    %c0_i32 = arith.constant 0 : i32
    %c0_i32_0 = arith.constant 0 : i32
    return %arg0, %c0_i32 : i32, i32
  }
  func.func @transform_1(%arg0: i32) -> (i32, i32) {
    %c0_i32 = arith.constant 0 : i32
    %c0_i32_0 = arith.constant 0 : i32
    %c0_i32_1 = arith.constant 0 : i32
    return %c0_i32, %c0_i32_0 : i32, i32
  }
  func.func @transform_2(%arg0: i32) -> (i32, i32) {
    %c0_i32 = arith.constant 0 : i32
    %c0_i32_0 = arith.constant 0 : i32
    %c0_i32_1 = arith.constant 0 : i32
    return %c0_i32, %c0_i32_0 : i32, i32
  }
  func.func @transform_3(%arg0: i32) -> (i32, i32) {
    %c0_i32 = arith.constant 0 : i32
    %c0_i32_0 = arith.constant 0 : i32
    %c0_i32_1 = arith.constant 0 : i32
    return %c0_i32, %c0_i32_0 : i32, i32
  }
  func.func @transform_4(%arg0: i32) -> (i32, i32) {
    %c0_i32 = arith.constant 0 : i32
    %c0_i32_0 = arith.constant 0 : i32
    %c0_i32_1 = arith.constant 0 : i32
    return %c0_i32, %c0_i32_0 : i32, i32
  }
  func.func @transform_5(%arg0: i32) -> (i32, i32) {
    %c0_i32 = arith.constant 0 : i32
    %c0_i32_0 = arith.constant 0 : i32
    return %arg0, %c0_i32 : i32, i32
  }
}

</mosaic_0001>

<bundles_post_ra>
// kernel: positionwise_ffn.1
= control target key start
LH: loop header
LB: loop body
LE: loop exit
PB: predicated region body
PF: predicated region fallthrough
CT: control target
= control target key end

     0   :  { %v358_v0 = vmov 0.0   ;;  %vm359_vm0 = vmmov 0   ;;  %s453_s1 = inlined_call_operand.vmem [shape: bf16[128,128], index: 1, kind: input, shape index: {}]   ;;  %s454_s3 = inlined_call_operand.vmem [shape: bf16[128,128], index: 3, kind: input, shape index: {}]   ;;  %s455_s0 = inlined_call_operand.vmem [shape: bf16[16,128], index: 0, kind: input, shape index: {}]   ;;  %s456_s2 = inlined_call_operand.vmem [shape: f32[1,128], index: 2, kind: input, shape index: {}]   ;;  %s457_s4 = inlined_call_operand.vmem [shape: f32[1,128], index: 4, kind: input, shape index: {}]   ;;  %s458_s5 = inlined_call_operand.vmem [shape: f32[16,128], index: 5, kind: output, shape index: {}]  }
   0x1   :  { %299 = vmatprep.subr.bf16.mxu0 %v358_v0  ;;  %v341_v1 = vld [vmem:[%s453_s1 + $0x38] sm:$0xff]   ;;  %315 = vmatprep.mubr.msk.bf16.mxu0 %vm359_vm0, %v358_v0  ;;  %v342_v2 = vld [vmem:[%s453_s1 + $0x30] sm:$0xff]   ;;  %v343_v3 = vld [vmem:[%s453_s1 + $0x28] sm:$0xff]  }
   0x2   :  { %319 = vmatprep.subr.bf16.mxu1 %v358_v0  ;;  %335 = vmatprep.mubr.msk.bf16.mxu1 %vm359_vm0, %v358_v0  ;;  %v350_v4 = vld [vmem:[%s454_s3 + $0x38] sm:$0xff]   ;;  %v344_v5 = vld [vmem:[%s453_s1 + $0x20] sm:$0xff]   ;;  %v351_v6 = vld [vmem:[%s454_s3 + $0x30] sm:$0xff]  }
   0x3   :  { %300 = vmatpush3.bf16.msra.mxu0 %v341_v1  ;;  %320 = vmatpush3.bf16.msra.mxu1 %v350_v4  ;;  %v345_v7 = vld [vmem:[%s453_s1 + $0x18] sm:$0xff]   ;;  %v352_v8 = vld [vmem:[%s454_s3 + $0x28] sm:$0xff]   ;;  %v346_v9 = vld [vmem:[%s453_s1 + $0x10] sm:$0xff]  }
   0x4   :  { %301 = vmatprep.subr.bf16.mxu0 %v358_v0  ;;  %321 = vmatprep.subr.bf16.mxu1 %v358_v0  ;;  %v353_v10 = vld [vmem:[%s454_s3 + $0x20] sm:$0xff]   ;;  %v347_v11 = vld [vmem:[%s453_s1 + $0x8] sm:$0xff]   ;;  %v354_v12 = vld [vmem:[%s454_s3 + $0x18] sm:$0xff]  }
   0x5   :  { %v348_v13 = vld [vmem:[%s453_s1] sm:$0xff]   ;;  %v355_v15 = vld [vmem:[%s454_s3 + $0x10] sm:$0xff]   ;;  %v356_v16 = vld [vmem:[%s454_s3 + $0x8] sm:$0xff]  }
   0x6   :  { %v349_v14 = vld [vmem:[%s455_s0] sm:$0xff]  }
   0x7   :  { %302 = vmatpush3.bf16.msra.mxu0 %v342_v2  ;;  %322 = vmatpush3.bf16.msra.mxu1 %v351_v6  ;;  %v357_v17 = vld [vmem:[%s454_s3] sm:$0xff]  }
   0x8   :  { %303 = vmatprep.subr.bf16.mxu0 %v358_v0  ;;  %323 = vmatprep.subr.bf16.mxu1 %v358_v0  ;;  %v262_v18 = vld [vmem:[%s456_s2] ss:$0 sm:$0xff] }
   0x9   :  { %v272_v28 = vld [vmem:[%s457_s4] ss:$0 sm:$0xff] }
   0xb   :  { %304 = vmatpush3.bf16.msra.mxu0 %v343_v3  ;;  %324 = vmatpush3.bf16.msra.mxu1 %v352_v8 }
   0xc   :  { %305 = vmatprep.subr.bf16.mxu0 %v358_v0  ;;  %325 = vmatprep.subr.bf16.mxu1 %v358_v0 }
   0xf   :  { %306 = vmatpush3.bf16.msra.mxu0 %v344_v5  ;;  %326 = vmatpush3.bf16.msra.mxu1 %v353_v10 }
  0x10   :  { %307 = vmatprep.subr.bf16.mxu0 %v358_v0  ;;  %327 = vmatprep.subr.bf16.mxu1 %v358_v0 }
  0x13   :  { %308 = vmatpush3.bf16.msra.mxu0 %v345_v7  ;;  %328 = vmatpush3.bf16.msra.mxu1 %v354_v12 }
  0x14   :  { %309 = vmatprep.subr.bf16.mxu0 %v358_v0  ;;  %329 = vmatprep.subr.bf16.mxu1 %v358_v0 }
  0x17   :  { %310 = vmatpush3.bf16.msra.mxu0 %v346_v9  ;;  %330 = vmatpush3.bf16.msra.mxu1 %v355_v15 }
  0x18   :  { %311 = vmatprep.subr.bf16.mxu0 %v358_v0  ;;  %331 = vmatprep.subr.bf16.mxu1 %v358_v0 }
  0x1b   :  { %312 = vmatpush3.bf16.msra.mxu0 %v347_v11  ;;  %332 = vmatpush3.bf16.msra.mxu1 %v356_v16 }
  0x1c   :  { %313 = vmatprep.subr.bf16.mxu0 %v358_v0  ;;  %333 = vmatprep.subr.bf16.mxu1 %v358_v0 }
  0x1f   :  { %314 = vmatpush3.bf16.msra.mxu0 %v348_v13  ;;  %334 = vmatpush3.bf16.msra.mxu1 %v357_v17 }
  0x22   :  { %316 = vmatmul.mubr.bf16.vlgmr.msra.gmra.mxu0 %v349_v14 }
  0xe2   :  { %v134_v19 = vpop.f32.mrf.mxu0 }
  0xe3   :  { %v135_v21 = vadd.f32 %v262_v18, %v134_v19 }
  0xe4   :  { %v317_v20 = vpop.f32.mrf.mxu0 }
  0xe5   :  { %v141_v25 = vmax.f32 %v135_v21, 0.0 }
  0xe6   :  { %v137_v22 = vpop.f32.mrf.mxu0 }
  0xe7   :  { %v138_v23 = vadd.f32 %v262_v18, %v137_v22 }
  0xe8   :  { %v318_v24 = vpop.f32.mrf.mxu0 }
  0xe9   :  { %v142_v26 = vmax.f32 %v138_v23, 0.0 }
  0xeb   :  { %v143_v27 = vpack.c.bf16 %v142_v26, %v141_v25 }
  0xed   :  { %336 = vmatmul.mubr.bf16.vlgmr.msra.gmra.mxu1 %v143_v27 }
 0x1ad   :  { %v249_v29 = vpop.f32.mrf.mxu1 }
 0x1ae   :  { %v250_v30 = vadd.f32 %v272_v28, %v249_v29 }
 0x1af   :  { %v337_v31 = vpop.f32.mrf.mxu1 }
 0x1b0   :  { %256 = vst [vmem:[%s458_s5] sm:$0xff] %v250_v30 }
 0x1b1   :  { %v252_v32 = vpop.f32.mrf.mxu1 }
 0x1b2   :  { %v253_v33 = vadd.f32 %v272_v28, %v252_v32 }
 0x1b3   :  { %v338_v34 = vpop.f32.mrf.mxu1 }
 0x1b4   :  { %257 = vst [vmem:[%s458_s5 + $0x8] sm:$0xff] %v253_v33 }

</bundles_post_ra>
